<compile_context>
chip_gen: v7x
topology: tpu7x:2x2x1
jax: 0.10.0
libtpu: 0.0.40
codegen_flags: <defaults>
</compile_context>

<pallas_src>
import functools

import jax
import jax.numpy as jnp
from jax import lax
from jax.experimental import pallas as pl
from jax.experimental.pallas import tpu as pltpu


BLOCK_SIZE = 5
P_DROP = 0.1
_VMEM_LIMIT = 48 * 1024 * 1024     # < v7x 64 MiB/TC physical; fine on v5e/v6e
_TILE_TARGET = 12 * 1024 * 1024    # per-tile working-set budget


# ---------------------------------------------------------------------------
# static planning helpers (all Python ints / floats)
# ---------------------------------------------------------------------------
def _round_up(a, b):
    return (a + b - 1) // b * b


def _calculate_gamma(W, block_size, p):
    # gamma exactly as the PyTorch module (uses W = x.shape[-1] only; mirrors
    # the module's implicit H == W assumption).
    invalid = (1.0 - p) / block_size ** 2
    valid = (W ** 2) / ((W - block_size + 1) ** 2)
    return float(invalid * valid)


def _plan(x_shape, x_dtype, block_size, p):
    N, C, H, W = x_shape
    assert block_size % 2 == 1, "DropBlock block_size must be odd"
    assert H >= block_size and W >= block_size
    pad = block_size // 2
    nc, hw = N * C, H * W
    off = pad * W + pad                 # flat offset of the (H,W) frame in g
    glen = hw + 2 * off                 # zero-bordered flat frame length
    gamma = _calculate_gamma(W, block_size, p)

    itemsize = jnp.dtype(x_dtype).itemsize
    align = {1: 32, 2: 16}.get(itemsize, 8)        # sublane packing alignment
    # Real per-row working set (worst of the two passes): g tile (f32,
    # double-buffered) + ~3 f32 pooling intermediates + keep/x/out tiles
    # (x.dtype, double-buffered).
    row_bytes = 5 * glen * 4 + 6 * hw * itemsize
    cap = max(align, (_TILE_TARGET // row_bytes) // align * align)

    nc_a = _round_up(nc, align)         # pad N*C up instead of one huge tile
    tile_nc = align
    t = align
    while t <= min(cap, nc_a):          # largest aligned divisor within budget
        if nc_a % t == 0:
            tile_nc = t
        t += align

    return dict(N=N, C=C, H=H, W=W, nc=nc, hw=hw, pad=pad, off=off, glen=glen,
                gamma=gamma, tile_nc=tile_nc, nc_p=nc_a,
                num_tiles=nc_a // tile_nc)


def _draw_bernoulli(key, shape, gamma):
    # Same draw the PyTorch module makes over the valid interior.
    return jax.random.bernoulli(key, gamma, shape).astype(jnp.float32)


# ---------------------------------------------------------------------------
# in-kernel helpers
# ---------------------------------------------------------------------------
def _windowed_max(t, window, stride):
    """out[:, j] = max_{k in [0, window)} t[:, j + k*stride]  (log-depth).

    For window=5 this is 3 shifted maxima instead of 4 (perf review item).
    """
    n = t.shape[-1]
    out_len = n - (window - 1) * stride
    covered = 1
    while covered * 2 <= window:
        s = covered * stride
        m = t.shape[-1] - s
        t = jnp.maximum(t[:, :m], t[:, s:s + m])
        covered *= 2
    if covered < window:
        s = (window - covered) * stride
        return jnp.maximum(t[:, :out_len], t[:, s:s + out_len])
    return t[:, :out_len]


# ---------------------------------------------------------------------------
# kernels
# ---------------------------------------------------------------------------
def _pool_kernel(g_ref, keep_ref, part_ref, *, block_size, W):
    """5x5 stride-1 max pool of the flat zero-bordered Bernoulli frame.

    The >= pad-wide zero border of g makes flat lane shifts exactly
    equivalent to 2-D zero-padded window offsets, so the pool is separable
    on the flat frame with static slices only.
    """
    g = g_ref[...]                                  # (tile_nc, glen) f32
    rm = _windowed_max(g, block_size, 1)            # row pass  (3 shifts)
    pooled = _windowed_max(rm, block_size, W)       # col pass -> (tile_nc, hw)
    keep = 1.0 - pooled
    keep_ref[...] = keep.astype(keep_ref.dtype)
    # per-tile partial keep-count, splat across a lane-dense (1,8,128) block.
    # TODO(synk): f32 counts are exact up to 2^24 kept elems per tile; switch
    # to int32 partials for absurdly large activations.
    part_ref[...] = jnp.broadcast_to(jnp.sum(keep), part_ref.shape)


def _apply_kernel(scale_ref, x_ref, keep_ref, o_ref):
    """Streaming pass: out = x * keep * scale (memory bound, 3 HBM streams)."""
    scale = scale_ref[0, 0]
    o_ref[...] = (x_ref[...].astype(jnp.float32)
                  * keep_ref[...].astype(jnp.float32)
                  * scale).astype(o_ref.dtype)


# ---------------------------------------------------------------------------
# wrapper
# ---------------------------------------------------------------------------
def dropblock_forward(x, key, *, block_size=BLOCK_SIZE, p=P_DROP,
                      training=True):
    """JAX/Pallas equivalent of DropBlock.forward (NCHW input)."""
    if not training:
        return x

    cfg = _plan(x.shape, x.dtype, block_size, p)
    N, C, H, W = x.shape
    nc, hw, off, glen, pad = cfg["nc"], cfg["hw"], cfg["off"], cfg["glen"], cfg["pad"]
    tile_nc, nc_p, num_tiles = cfg["tile_nc"], cfg["nc_p"], cfg["num_tiles"]
    pad_rows = nc_p - nc

    # Bernoulli field exactly like the PyTorch module: drawn over the valid
    # interior, zero-padded border.  Drawn with jax.random (portable; no
    # TPU-only stateful PRNG) and independent of the tiling plan.
    bern = _draw_bernoulli(
        key, (N, C, H - block_size + 1, W - block_size + 1), cfg["gamma"])
    mask = jnp.pad(bern, ((0, 0), (0, 0), (pad, pad), (pad, pad)))  # (N,C,H,W)

    # lane-dense flat frame with an `off`-wide zero border on both ends so the
    # in-kernel flat shifts are exactly the 2-D zero-padded window offsets.
    g = jnp.pad(mask.reshape(nc, hw), ((0, pad_rows), (off, off)))  # (nc_p, glen)
    x2 = jnp.pad(x.reshape(nc, hw), ((0, pad_rows), (0, 0)))        # (nc_p, hw)

    params = pltpu.CompilerParams(dimension_semantics=("parallel",),
                                  vmem_limit_bytes=_VMEM_LIMIT)

    # ---- pass 1: pool once, cache keep mask + per-tile partial counts ------
    keep, parts = pl.pallas_call(
        functools.partial(_pool_kernel, block_size=block_size, W=W),
        grid=(num_tiles,),
        in_specs=[pl.BlockSpec((tile_nc, glen), lambda i: (i, 0))],
        out_specs=(pl.BlockSpec((tile_nc, hw), lambda i: (i, 0)),
                   pl.BlockSpec((1, 8, 128), lambda i: (i, 0, 0))),
        out_shape=(jax.ShapeDtypeStruct((nc_p, hw), x.dtype),
                   jax.ShapeDtypeStruct((num_tiles, 8, 128), jnp.float32)),
        compiler_params=params,
    )(g)

    # numel / sum(keep) over the REAL rows only; each padded row (all-zero
    # frame -> keep == 1 everywhere) contributes exactly hw to the raw total.
    # All-dropped case guarded with max(total, 1) instead of PyTorch's inf/nan.
    total = jnp.sum(parts[:, 0, 0]) - jnp.float32(pad_rows * hw)
    scale = (jnp.float32(nc * hw) / jnp.maximum(total, 1.0)).reshape(1, 1)

    # ---- pass 2: streamed out = x * keep * scale ----------------------------
    out2 = pl.pallas_call(
        _apply_kernel,
        grid=(num_tiles,),
        in_specs=[pl.BlockSpec(memory_space=pltpu.MemorySpace.SMEM),
                  pl.BlockSpec((tile_nc, hw), lambda i: (i, 0)),
                  pl.BlockSpec((tile_nc, hw), lambda i: (i, 0))],
        out_specs=pl.BlockSpec((tile_nc, hw), lambda i: (i, 0)),
        out_shape=jax.ShapeDtypeStruct((nc_p, hw), x.dtype),
        compiler_params=params,
    )(scale, x2, keep)

    return out2[:nc].reshape(x.shape)


# ---------------------------------------------------------------------------
# pure-JAX reference (consumes the identical Bernoulli draw)
# ---------------------------------------------------------------------------
def _reference(x, key, block_size=BLOCK_SIZE, p=P_DROP):
    N, C, H, W = x.shape
    pad = block_size // 2
    gamma = _calculate_gamma(W, block_size, p)
    bern = _draw_bernoulli(
        key, (N, C, H - block_size + 1, W - block_size + 1), gamma)
    mask = jnp.pad(bern, ((0, 0), (0, 0), (pad, pad), (pad, pad)))
    pooled = lax.reduce_window(
        mask, -jnp.inf, lax.max,
        window_dimensions=(1, 1, block_size, block_size),
        window_strides=(1, 1, 1, 1),
        padding=((0, 0), (0, 0), (pad, pad), (pad, pad)))
    keep = 1.0 - pooled
    scale = jnp.float32(keep.size) / jnp.maximum(jnp.sum(keep), 1.0)
    return (keep * x.astype(jnp.float32) * scale).astype(x.dtype)


# ---------------------------------------------------------------------------
if __name__ == "__main__":
    key = jax.random.PRNGKey(0)
    kx, kmask = jax.random.split(key)

    N, C, H, W = 2, 4, 16, 16
    x = jax.random.normal(kx, (N, C, H, W), dtype=jnp.float32)

    out = jax.block_until_ready(dropblock_forward(x, kmask, training=True))
    assert out.shape == x.shape and out.dtype == x.dtype

    # eval mode is the identity
    assert jnp.array_equal(dropblock_forward(x, kmask, training=False), x)

    # correctness vs. a pure-JAX reference consuming the same Bernoulli draw
    ref = _reference(x, kmask)
    assert jnp.allclose(out, ref, rtol=1e-5, atol=1e-5), (
        "max abs err = %g" % float(jnp.max(jnp.abs(out - ref))))

    # non-square shape with N*C not a multiple of 8: exercises the row-padding
    # path and the flat-shift pooling equivalence beyond H == W == 16.
    x2 = jax.random.normal(kx, (1, 3, 12, 20), dtype=jnp.float32)
    out2 = jax.block_until_ready(dropblock_forward(x2, kmask, training=True))
    ref2 = _reference(x2, kmask)
    assert jnp.allclose(out2, ref2, rtol=1e-5, atol=1e-5), (
        "max abs err = %g" % float(jnp.max(jnp.abs(out2 - ref2))))

    print("KERNEL_OK")
</pallas_src>

<mosaic_0001>
module attributes {stable_mosaic.version = 11 : i64} {
  func.func @_pool_kernel(%arg0: i32, %arg1: memref<8x324xf32, #tpu.memory_space<vmem>>, %arg2: memref<8x256xf32, #tpu.memory_space<vmem>>, %arg3: memref<1x8x128xf32, #tpu.memory_space<vmem>>) attributes {dimension_semantics = [#tpu.dimension_semantics<parallel>], iteration_bounds = array<i64: 1>, scalar_prefetch = 0 : i64, scratch_operands = 0 : i64, tpu.core_type = #tpu.core_type<tc>, window_params = [{transform_indices = @transform_0, window_bounds = array<i64: 8, 324>}, {transform_indices = @transform_1, window_bounds = array<i64: 8, 256>}, {transform_indices = @transform_2, window_bounds = array<i64: 1, 8, 128>}]} {
    %c0 = arith.constant 0 : index
    %c0_0 = arith.constant 0 : index
    %0 = vector.load %arg1[%c0, %c0_0] : memref<8x324xf32, #tpu.memory_space<vmem>>, vector<8x324xf32>
    %1 = vector.extract_strided_slice %0 {offsets = [0, 0], sizes = [8, 323], strides = [1, 1]} : vector<8x324xf32> to vector<8x323xf32>
    %2 = vector.extract_strided_slice %0 {offsets = [0, 1], sizes = [8, 323], strides = [1, 1]} : vector<8x324xf32> to vector<8x323xf32>
    %3 = arith.maximumf %1, %2 : vector<8x323xf32>
    %4 = vector.extract_strided_slice %3 {offsets = [0, 0], sizes = [8, 321], strides = [1, 1]} : vector<8x323xf32> to vector<8x321xf32>
    %5 = vector.extract_strided_slice %3 {offsets = [0, 2], sizes = [8, 321], strides = [1, 1]} : vector<8x323xf32> to vector<8x321xf32>
    %6 = arith.maximumf %4, %5 : vector<8x321xf32>
    %7 = vector.extract_strided_slice %6 {offsets = [0, 0], sizes = [8, 320], strides = [1, 1]} : vector<8x321xf32> to vector<8x320xf32>
    %8 = vector.extract_strided_slice %6 {offsets = [0, 1], sizes = [8, 320], strides = [1, 1]} : vector<8x321xf32> to vector<8x320xf32>
    %9 = arith.maximumf %7, %8 : vector<8x320xf32>
    %10 = vector.extract_strided_slice %9 {offsets = [0, 0], sizes = [8, 304], strides = [1, 1]} : vector<8x320xf32> to vector<8x304xf32>
    %11 = vector.extract_strided_slice %9 {offsets = [0, 16], sizes = [8, 304], strides = [1, 1]} : vector<8x320xf32> to vector<8x304xf32>
    %12 = arith.maximumf %10, %11 : vector<8x304xf32>
    %13 = vector.extract_strided_slice %12 {offsets = [0, 0], sizes = [8, 272], strides = [1, 1]} : vector<8x304xf32> to vector<8x272xf32>
    %14 = vector.extract_strided_slice %12 {offsets = [0, 32], sizes = [8, 272], strides = [1, 1]} : vector<8x304xf32> to vector<8x272xf32>
    %15 = arith.maximumf %13, %14 : vector<8x272xf32>
    %16 = vector.extract_strided_slice %15 {offsets = [0, 0], sizes = [8, 256], strides = [1, 1]} : vector<8x272xf32> to vector<8x256xf32>
    %17 = vector.extract_strided_slice %15 {offsets = [0, 16], sizes = [8, 256], strides = [1, 1]} : vector<8x272xf32> to vector<8x256xf32>
    %18 = arith.maximumf %16, %17 : vector<8x256xf32>
    %cst = arith.constant 1.000000e+00 : f32
    %19 = vector.broadcast %cst : f32 to vector<8x256xf32>
    %20 = arith.subf %19, %18 : vector<8x256xf32>
    %c0_1 = arith.constant 0 : index
    %c0_2 = arith.constant 0 : index
    %21 = vector.load %arg2[%c0_1, %c0_2] : memref<8x256xf32, #tpu.memory_space<vmem>>, vector<8x256xf32>
    tpu.vector_store %arg2[%c0_1, %c0_2], %20 {strides = array<i32>} : memref<8x256xf32, #tpu.memory_space<vmem>>, vector<8x256xf32>,
    %22 = vector.shape_cast %20 : vector<8x256xf32> to vector<1x8x256xf32>
    %cst_3 = arith.constant dense<0.000000e+00> : vector<1xf32>
    %23 = vector.multi_reduction <add>, %22, %cst_3 [1, 2] : vector<1x8x256xf32> to vector<1xf32>
    %24 = vector.shape_cast %23 : vector<1xf32> to vector<1x1x1xf32>
    %25 = vector.extract %24[0, 0, 0] : f32 from vector<1x1x1xf32>
    %26 = vector.broadcast %25 : f32 to vector<1x8x128xf32>
    %c0_4 = arith.constant 0 : index
    %c0_5 = arith.constant 0 : index
    %c0_6 = arith.constant 0 : index
    %27 = vector.load %arg3[%c0_4, %c0_5, %c0_6] : memref<1x8x128xf32, #tpu.memory_space<vmem>>, vector<1x8x128xf32>
    tpu.vector_store %arg3[%c0_4, %c0_5, %c0_6], %26 {strides = array<i32>} : memref<1x8x128xf32, #tpu.memory_space<vmem>>, vector<1x8x128xf32>,
    return
  }
  func.func @transform_0(%arg0: i32) -> (i32, i32) {
    %c0_i32 = arith.constant 0 : i32
    %c0_i32_0 = arith.constant 0 : i32
    return %arg0, %c0_i32 : i32, i32
  }
  func.func @transform_1(%arg0: i32) -> (i32, i32) {
    %c0_i32 = arith.constant 0 : i32
    %c0_i32_0 = arith.constant 0 : i32
    return %arg0, %c0_i32 : i32, i32
  }
  func.func @transform_2(%arg0: i32) -> (i32, i32, i32) {
    %c0_i32 = arith.constant 0 : i32
    %c0_i32_0 = arith.constant 0 : i32
    %c0_i32_1 = arith.constant 0 : i32
    return %arg0, %c0_i32, %c0_i32_0 : i32, i32, i32
  }
}

</mosaic_0001>

<bundles_post_ra>
// kernel: tpu_custom_call.1
= control target key start
LH: loop header
LB: loop body
LE: loop exit
PB: predicated region body
PF: predicated region fallthrough
CT: control target
= control target key end

     0   :  { %8 = vsyncpa [#allocation3], 0  ;;  %s323_s0 = inlined_call_operand.hbm [shape: f32[8,324], index: 0, kind: input, shape index: {}]   ;;  %s324_s1 = inlined_call_operand.hbm [shape: f32[8,256], index: 1, kind: output, shape index: {0}]   ;;  %s325_s2 = inlined_call_operand.hbm [shape: f32[1,8,128], index: 2, kind: output, shape index: {1}]  }
   0x1   :  { %9 = vsyncpa [#allocation4], 0 }
   0x2   :  { %10 = vsyncpa [#allocation7], 0  ;;  %s257_s9 = smov [#allocation2]   ;;  %s185_s13 = scalar_lea.hbm %s323_s0, 384 }
   0x3   :  { %s17_s10 = sshll.u32 %s257_s9, 4  ;;  %p186_p0 = scmp.ne.s32.totalorder %s323_s0, %s185_s13  ;;  %s18_s10 = int_to_ptr.vmem [resolvable:$true] %s17_s10 }
   0x4   :  { %p189_p1 = scmp.lt.u32.totalorder %s185_s13, %s323_s0 }
   0x6   :  { %p191_p2 = pnand %p189_p1, %p186_p0 }
   0x8   :  { %194 = shalt.err (!%p191_p2)
}
   0x9   :  { %s195_s18 = scalar_lea.vmem %s18_s10, 384  ;;  %p200_p4 = scmp.lt.s32.totalorder %s18_s10, %s18_s10 }
   0xa   :  { %p196_p3 = scmp.ne.s32.totalorder %s18_s10, %s195_s18  ;;  %p201_p5 = scmp.lt.s32.totalorder %s195_s18, %s195_s18 }
   0xc   :  { %p202_p6 = por %p201_p5, %p200_p4 }
   0xe   :  { %p203_p7 = pnand %p202_p6, %p196_p3 }
  0x10   :  { %206 = shalt.err (!%p203_p7)
}
  0x11   :  { %20 = dma.hbm_to_vmem [thread:$0]  %s323_s0, 384, %s18_s10, [#allocation3]  }
  0x12   :  { %251 = dma.done.wait [#allocation3], 384  }
  0x13   :  { %252 = vsyncadd [#allocation3], 4294966912  ;;  %v24_v0 = vld [vmem:[#allocation2] sm:$0xff]  ;;  %v26_v1 = vld [vmem:[#allocation2 + $0x10] sm:$0xff]  ;;  %s258_s21 = smov 127   ;;  %vm36_vm0 = vcmask 1039360  }
  0x14   :  { %30 = vrot.lane.b32.xlu0 %v24_v0, %s258_s21  ;;  %34 = vrot.lane.b32.xlu1 %v26_v1, %s258_s21  ;;  %v25_v2 = vld [vmem:[#allocation2 + $0x8] sm:$0xff]  ;;  %s259_s0 = smov 126   ;;  %vm54_vm1 = vcmask 1031168   ;;  %s260_s22 = smov 112   ;;  %vm89_vm2 = vcmask 916480   ;;  %vm107_vm3 = vcmask 785408  }
  0x15   :  { %s261_s23 = smov 96   ;;  %s262_s24 = smov [#allocation5]  }
  0x16   :  { %s153_s25 = sshll.u32 %s262_s24, 4  ;;  %s154_s25 = int_to_ptr.vmem [resolvable:$true] %s153_s25 }
  0x17   :  { %s207_s26 = scalar_lea.vmem %s154_s25, 256  ;;  %p212_p9 = scmp.lt.s32.totalorder %s154_s25, %s154_s25 }
  0x18   :  { %32 = vrot.lane.b32.xlu0 %v25_v2, %s258_s21  ;;  %p208_p8 = scmp.ne.s32.totalorder %s154_s25, %s207_s26  ;;  %p213_p10 = scmp.lt.s32.totalorder %s207_s26, %s207_s26 }
  0x1a   :  { %p214_p11 = por %p213_p10, %p212_p9 }
  0x1c   :  { %p215_p12 = pnand %p214_p11, %p208_p8 }
  0x86   :  { %v31_v3 = vpop.permute.xlu0 %30  ;;  %v35_v4 = vpop.permute.xlu1 %34 }
  0x87   :  { %v44_v10 = vmax.f32 %v26_v1, %v35_v4 }
  0x8a   :  { %v33_v5 = vpop.permute.xlu0 %32 }
  0x8b   :  { %v37_v6 = vsel %vm36_vm0, %v31_v3, %v33_v5  ;;  %v38_v7 = vsel %vm36_vm0, %v33_v5, %v35_v4 }
  0x8c   :  { %v42_v8 = vmax.f32 %v24_v0, %v37_v6  ;;  %v43_v9 = vmax.f32 %v25_v2, %v38_v7 }
  0x8e   :  { %50 = vrot.lane.b32.xlu0 %v43_v9, %s259_s0  ;;  %48 = vrot.lane.b32.xlu1 %v42_v8, %s259_s0 }
  0x92   :  { %52 = vrot.lane.b32.xlu1 %v44_v10, %s259_s0 }
 0x100   :  { %v51_v11 = vpop.permute.xlu0 %50  ;;  %v49_v12 = vpop.permute.xlu1 %48 }
 0x101   :  { %v55_v13 = vsel %vm54_vm1, %v49_v12, %v51_v11 }
 0x102   :  { %v60_v14 = vmax.f32 %v42_v8, %v55_v13 }
 0x104   :  { %66 = vrot.lane.b32.xlu0 %v60_v14, %s258_s21  ;;  %v53_v15 = vpop.permute.xlu1 %52 }
 0x105   :  { %v56_v16 = vsel %vm54_vm1, %v51_v11, %v53_v15  ;;  %v62_v17 = vmax.f32 %v44_v10, %v53_v15 }
 0x106   :  { %v61_v18 = vmax.f32 %v43_v9, %v56_v16 }
 0x108   :  { %70 = vrot.lane.b32.xlu0 %v62_v17, %s258_s21  ;;  %68 = vrot.lane.b32.xlu1 %v61_v18, %s258_s21 }
 0x176   :  { %v67_v19 = vpop.permute.xlu0 %66 }
 0x17a   :  { %v71_v20 = vpop.permute.xlu0 %70  ;;  %v69_v21 = vpop.permute.xlu1 %68 }
 0x17b   :  { %v72_v22 = vsel %vm36_vm0, %v67_v19, %v69_v21  ;;  %v73_v23 = vsel %vm36_vm0, %v69_v21, %v71_v20  ;;  %v79_v26 = vmax.f32 %v62_v17, %v71_v20 }
 0x17c   :  { %v77_v24 = vmax.f32 %v60_v14, %v72_v22  ;;  %v78_v25 = vmax.f32 %v61_v18, %v73_v23 }
 0x17e   :  { %85 = vrot.lane.b32.xlu0 %v78_v25, %s260_s22  ;;  %83 = vrot.lane.b32.xlu1 %v77_v24, %s260_s22 }
 0x182   :  { %87 = vrot.lane.b32.xlu1 %v79_v26, %s260_s22 }
 0x1f0   :  { %v86_v27 = vpop.permute.xlu0 %85  ;;  %v84_v28 = vpop.permute.xlu1 %83 }
 0x1f1   :  { %v90_v29 = vsel %vm89_vm2, %v84_v28, %v86_v27 }
 0x1f2   :  { %v95_v30 = vmax.f32 %v77_v24, %v90_v29 }
 0x1f4   :  { %101 = vrot.lane.b32.xlu0 %v95_v30, %s261_s23  ;;  %v88_v31 = vpop.permute.xlu1 %87 }
 0x1f5   :  { %v91_v32 = vsel %vm89_vm2, %v86_v27, %v88_v31  ;;  %v97_v33 = vmax.f32 %v79_v26, %v88_v31 }
 0x1f6   :  { %v96_v34 = vmax.f32 %v78_v25, %v91_v32 }
 0x1f8   :  { %105 = vrot.lane.b32.xlu0 %v97_v33, %s261_s23  ;;  %103 = vrot.lane.b32.xlu1 %v96_v34, %s261_s23 }
 0x266   :  { %v102_v35 = vpop.permute.xlu0 %101 }
 0x26a   :  { %v106_v36 = vpop.permute.xlu0 %105  ;;  %v104_v37 = vpop.permute.xlu1 %103 }
 0x26b   :  { %v108_v38 = vsel %vm107_vm3, %v102_v35, %v104_v37  ;;  %v109_v39 = vsel %vm107_vm3, %v104_v37, %v106_v36  ;;  %v115_v42 = vmax.f32 %v97_v33, %v106_v36 }
 0x26c   :  { %v113_v40 = vmax.f32 %v95_v30, %v108_v38  ;;  %v114_v41 = vmax.f32 %v96_v34, %v109_v39 }
 0x26e   :  { %121 = vrot.lane.b32.xlu0 %v114_v41, %s260_s22  ;;  %119 = vrot.lane.b32.xlu1 %v113_v40, %s260_s22 }
 0x272   :  { %123 = vrot.lane.b32.xlu1 %v115_v42, %s260_s22 }
 0x2e0   :  { %v122_v43 = vpop.permute.xlu0 %121  ;;  %v120_v44 = vpop.permute.xlu1 %119 }
 0x2e1   :  { %v125_v45 = vsel %vm89_vm2, %v120_v44, %v122_v43 }
 0x2e2   :  { %v129_v46 = vmax.f32 %v113_v40, %v125_v45 }
 0x2e4   :  { %v131_v47 = vsub.f32 1.0, %v129_v46  ;;  %v124_v48 = vpop.permute.xlu1 %123 }
 0x2e5   :  { %v126_v49 = vsel %vm89_vm2, %v122_v43, %v124_v48 }
 0x2e6   :  { %133 = vst [vmem:[#allocation5] sm:$0xff] %v131_v47  ;;  %v130_v50 = vmax.f32 %v114_v41, %v126_v49 }
 0x2e8   :  { %v132_v51 = vsub.f32 1.0, %v130_v50 }
 0x2ea   :  { %134 = vst [vmem:[#allocation5 + $0x8] sm:$0xff] %v132_v51  ;;  %v135_v52 = vadd.f32 %v132_v51, %v131_v47 }
 0x2ec   :  { %136 = vadd.xlane.f32.xlu0 %v135_v52 }
 0x2ed   :  { %218 = shalt.err (!%p215_p12)
}
 0x2ee   :  { %s219_s29 = scalar_lea.hbm %s324_s1, 256 }
 0x2ef   :  { %p220_p13 = scmp.ne.s32.totalorder %s324_s1, %s219_s29  ;;  %p223_p0 = scmp.lt.u32.totalorder %s219_s29, %s324_s1 }
 0x2f1   :  { %p225_p1 = pnand %p223_p0, %p220_p13 }
 0x2f3   :  { %228 = shalt.err (!%p225_p1)
}
 0x2f4   :  { %156 = dma.vmem_to_hbm [thread:$0]  %s154_s25, 256, %s324_s1, [#allocation4]  }
 0x2f5   :  { %s263_s8 = smov [#allocation6]  }
 0x2f6   :  { %s163_s9 = sshll.u32 %s263_s8, 4  ;;  %s164_s9 = int_to_ptr.vmem [resolvable:$true] %s163_s9 }
 0x2f7   :  { %s229_s11 = scalar_lea.vmem %s164_s9, 128  ;;  %p234_p3 = scmp.lt.s32.totalorder %s164_s9, %s164_s9 }
 0x2f8   :  { %p230_p2 = scmp.ne.s32.totalorder %s164_s9, %s229_s11  ;;  %p235_p4 = scmp.lt.s32.totalorder %s229_s11, %s229_s11 }
 0x2fa   :  { %p236_p5 = por %p235_p4, %p234_p3 }
 0x2fc   :  { %p237_p6 = pnand %p236_p5, %p230_p2 }
 0x379   :  { %v137_v53 = vpop.xlane.xlu0 %136 }
 0x37a   :  { %v138_v54 = vrot.slane %v137_v53, 4 }
 0x37c   :  { %v139_v55 = vadd.f32 %v138_v54, %v137_v53 }
 0x37e   :  { %v140_v56 = vrot.slane %v139_v55, 2 }
 0x380   :  { %v141_v57 = vadd.f32 %v140_v56, %v139_v55 }
 0x382   :  { %v142_v58 = vrot.slane %v141_v57, 1 }
 0x384   :  { %v143_v59 = vadd.f32 %v142_v58, %v141_v57 }
 0x386   :  { %176 = vpush %v143_v59 }
 0x3b7   :  { %s177_s10 = spop %176 }
 0x3b8   :  { %v145_v60 = vstv %s177_s10 }
 0x3b9   :  { %146 = vst [vmem:[#allocation6] sm:$0xff] %v145_v60 }
 0x3ba   :  { %240 = shalt.err (!%p237_p6)
}
 0x3bb   :  { %s241_s13 = scalar_lea.hbm %s325_s2, 128 }
 0x3bc   :  { %p242_p7 = scmp.ne.s32.totalorder %s325_s2, %s241_s13  ;;  %p245_p8 = scmp.lt.u32.totalorder %s241_s13, %s325_s2 }
 0x3be   :  { %p247_p9 = pnand %p245_p8, %p242_p7 }
 0x3c0   :  { %250 = shalt.err (!%p247_p9)
}
 0x3c1   :  { %166 = dma.vmem_to_hbm [thread:$0]  %s164_s9, 128, %s325_s2, [#allocation7]  }
 0x3c2   :  { %253 = dma.done.wait [#allocation4], 256  }
 0x3c3   :  { %254 = vsyncadd [#allocation4], 4294967040 }
 0x3c4   :  { %255 = dma.done.wait [#allocation7], 128  }
 0x3c5   :  { %256 = vsyncadd [#allocation7], 4294967168 }
 0x3c6   :  { %173 = vsyncpa [#allocation3], 1 }
 0x3c7   :  { %174 = vsyncpa [#allocation4], 1 }
 0x3c8   :  { %175 = vsyncpa [#allocation7], 1 }

</bundles_post_ra>
